<compile_context>
chip_gen: v7x
topology: tpu7x:2x2x1
jax: 0.10.0
libtpu: 0.0.40
codegen_flags: <defaults>
</compile_context>

<pallas_src>
import functools

import jax
import jax.numpy as jnp
from jax.experimental import pallas as pl
from jax.experimental.pallas import tpu as pltpu


def _triplet_loss_kernel(a_ref, p_ref, n_ref, out_ref, *, margin, batch, tb):
    # Promote to f32 in-kernel (inputs are streamed from HBM in native dtype).
    a = a_ref[...].astype(jnp.float32)

    # Fully reduce the a-p branch before reading n, to halve live intermediates.
    d_ap_v = a - p_ref[...].astype(jnp.float32)
    sq_ap = jnp.sum(d_ap_v * d_ap_v, axis=1, keepdims=True)        # (TB, 1)

    d_an_v = a - n_ref[...].astype(jnp.float32)
    sq_an = jnp.sum(d_an_v * d_an_v, axis=1, keepdims=True)        # (TB, 1)

    per_sample = jnp.maximum(jnp.sqrt(sq_ap) - jnp.sqrt(sq_an) + margin, 0.0)

    # Mask rows of the (possibly partial) last block; the where-select also
    # quashes any Inf/NaN produced from the unspecified out-of-range rows.
    row_ids = pl.program_id(0) * tb + jax.lax.broadcasted_iota(
        jnp.int32, (tb, 1), 0)
    per_sample = jnp.where(row_ids < batch, per_sample, 0.0)

    partial = jnp.sum(per_sample)                                   # scalar
    out_ref[...] = jnp.full((1, 8, 128), partial, dtype=jnp.float32)


def triplet_loss(a, p, n, margin=0.2):
    """Pallas TPU implementation of TripletLoss.forward(a, p, n)."""
    assert a.shape == p.shape == n.shape and a.ndim == 2
    B, D = a.shape
    itemsize = jnp.dtype(a.dtype).itemsize

    # Batch tile: target ~1 MiB per input block, multiple of 8, no padding.
    tb_target = ((1 << 20) // max(1, D * itemsize)) // 8 * 8
    tb_target = int(max(8, min(tb_target, 8192)))
    TB = int(min(tb_target, ((B + 7) // 8) * 8))
    num_blocks = pl.cdiv(B, TB)

    kernel = functools.partial(
        _triplet_loss_kernel,
        margin=float(margin),   # Python scalars -> immediates in the kernel
        batch=int(B),
        tb=int(TB),
    )

    # Block dims: TB is a multiple of 8; the feature dim is the FULL array dim
    # (legal even when < 128), so no feature padding / extra HBM traffic.
    in_spec = pl.BlockSpec((TB, D), lambda i: (i, 0))

    # VMEM budget: 3 inputs x 2 pipeline buffers in native dtype, plus a few
    # f32 intermediate tiles; raise v5e's 16 MiB scoped default if needed and
    # stay well under v7x's 64 MiB physical VMEM.
    block_bytes = TB * D * itemsize
    vmem_need = 3 * 2 * block_bytes + 6 * TB * D * 4 + (1 << 20)
    vmem_limit = int(min(48 << 20, max(16 << 20, vmem_need)))

    cost = pl.CostEstimate(
        flops=8 * B * D,
        transcendentals=2 * B,
        bytes_accessed=3 * B * D * itemsize + num_blocks * 8 * 128 * 4,
    )

    partials = pl.pallas_call(
        kernel,
        out_shape=jax.ShapeDtypeStruct((num_blocks, 8, 128), jnp.float32),
        grid=(num_blocks,),
        in_specs=[in_spec, in_spec, in_spec],
        out_specs=pl.BlockSpec((1, 8, 128), lambda i: (i, 0, 0)),
        compiler_params=pltpu.CompilerParams(
            dimension_semantics=("parallel",),
            vmem_limit_bytes=vmem_limit,
        ),
        cost_estimate=cost,
    )(a, p, n)

    # Each block broadcast its partial sum into its (8,128) slab; take one
    # element per block, sum, and divide by the true batch size.
    return jnp.sum(partials[:, 0, 0]) / jnp.float32(B)


if __name__ == "__main__":
    key = jax.random.PRNGKey(0)
    ka, kp, kn = jax.random.split(key, 3)

    B, D = 8, 32  # small (batch, hidden) embeddings
    a = jax.random.normal(ka, (B, D), dtype=jnp.float32)
    p = jax.random.normal(kp, (B, D), dtype=jnp.float32)
    n = jax.random.normal(kn, (B, D), dtype=jnp.float32)

    loss = triplet_loss(a, p, n, margin=0.2)
    jax.block_until_ready(loss)

    # Pure-JAX reference of the same semantics as the PyTorch module.
    d_ap = jnp.linalg.norm(a - p, axis=1)
    d_an = jnp.linalg.norm(a - n, axis=1)
    ref = jnp.mean(jnp.maximum(d_ap - d_an + 0.2, 0.0))
    assert jnp.allclose(loss, ref, atol=1e-5, rtol=1e-5), (loss, ref)

    print("KERNEL_OK")
</pallas_src>

<mosaic_0001>
module attributes {stable_mosaic.version = 11 : i64} {
  func.func @_triplet_loss_kernel(%arg0: i32, %arg1: memref<8x32xf32, #tpu.memory_space<vmem>>, %arg2: memref<8x32xf32, #tpu.memory_space<vmem>>, %arg3: memref<8x32xf32, #tpu.memory_space<vmem>>, %arg4: memref<1x8x128xf32, #tpu.memory_space<vmem>>) attributes {dimension_semantics = [#tpu.dimension_semantics<parallel>], iteration_bounds = array<i64: 1>, scalar_prefetch = 0 : i64, scratch_operands = 0 : i64, tpu.core_type = #tpu.core_type<tc>, window_params = [{transform_indices = @transform_0, window_bounds = array<i64: 8, 32>}, {transform_indices = @transform_1, window_bounds = array<i64: 8, 32>}, {transform_indices = @transform_2, window_bounds = array<i64: 8, 32>}, {transform_indices = @transform_3, window_bounds = array<i64: 1, 8, 128>}]} {
    %c0 = arith.constant 0 : index
    %c0_0 = arith.constant 0 : index
    %0 = vector.load %arg1[%c0, %c0_0] : memref<8x32xf32, #tpu.memory_space<vmem>>, vector<8x32xf32>
    %c0_1 = arith.constant 0 : index
    %c0_2 = arith.constant 0 : index
    %1 = vector.load %arg2[%c0_1, %c0_2] : memref<8x32xf32, #tpu.memory_space<vmem>>, vector<8x32xf32>
    %2 = arith.subf %0, %1 : vector<8x32xf32>
    %3 = arith.mulf %2, %2 : vector<8x32xf32>
    %cst = arith.constant dense<0.000000e+00> : vector<8xf32>
    %4 = vector.multi_reduction <add>, %3, %cst [1] : vector<8x32xf32> to vector<8xf32>
    %5 = vector.shape_cast %4 : vector<8xf32> to vector<8x1xf32>
    %c0_3 = arith.constant 0 : index
    %c0_4 = arith.constant 0 : index
    %6 = vector.load %arg3[%c0_3, %c0_4] : memref<8x32xf32, #tpu.memory_space<vmem>>, vector<8x32xf32>
    %7 = arith.subf %0, %6 : vector<8x32xf32>
    %8 = arith.mulf %7, %7 : vector<8x32xf32>
    %cst_5 = arith.constant dense<0.000000e+00> : vector<8xf32>
    %9 = vector.multi_reduction <add>, %8, %cst_5 [1] : vector<8x32xf32> to vector<8xf32>
    %10 = vector.shape_cast %9 : vector<8xf32> to vector<8x1xf32>
    %11 = math.sqrt %5 : vector<8x1xf32>
    %12 = math.sqrt %10 : vector<8x1xf32>
    %13 = arith.subf %11, %12 : vector<8x1xf32>
    %cst_6 = arith.constant 2.000000e-01 : f32
    %14 = vector.broadcast %cst_6 : f32 to vector<8x1xf32>
    %15 = arith.addf %13, %14 : vector<8x1xf32>
    %cst_7 = arith.constant 0.000000e+00 : f32
    %16 = vector.broadcast %cst_7 : f32 to vector<8x1xf32>
    %17 = arith.maximumf %15, %16 : vector<8x1xf32>
    %c8_i32 = arith.constant 8 : i32
    %18 = arith.muli %arg0, %c8_i32 : i32
    %19 = tpu.iota {dimensions = array<i32: 0>} : vector<8x1xi32>
    %20 = vector.broadcast %18 : i32 to vector<8x1xi32>
    %21 = arith.addi %20, %19 : vector<8x1xi32>
    %c8_i32_8 = arith.constant 8 : i32
    %22 = vector.broadcast %c8_i32_8 : i32 to vector<8x1xi32>
    %23 = arith.cmpi slt, %21, %22 : vector<8x1xi32>
    %cst_9 = arith.constant 0.000000e+00 : f32
    %24 = vector.broadcast %cst_9 : f32 to vector<8x1xf32>
    %25 = arith.select %23, %17, %24 : vector<8x1xi1>, vector<8x1xf32>
    %26 = vector.shape_cast %25 : vector<8x1xf32> to vector<1x8x1xf32>
    %cst_10 = arith.constant dense<0.000000e+00> : vector<1xf32>
    %27 = vector.multi_reduction <add>, %26, %cst_10 [1, 2] : vector<1x8x1xf32> to vector<1xf32>
    %28 = vector.shape_cast %27 : vector<1xf32> to vector<1x1x1xf32>
    %29 = vector.extract %28[0, 0, 0] : f32 from vector<1x1x1xf32>
    %30 = vector.broadcast %29 : f32 to vector<1x8x128xf32>
    %c0_11 = arith.constant 0 : index
    %c0_12 = arith.constant 0 : index
    %c0_13 = arith.constant 0 : index
    %31 = vector.load %arg4[%c0_11, %c0_12, %c0_13] : memref<1x8x128xf32, #tpu.memory_space<vmem>>, vector<1x8x128xf32>
    tpu.vector_store %arg4[%c0_11, %c0_12, %c0_13], %30 {strides = array<i32>} : memref<1x8x128xf32, #tpu.memory_space<vmem>>, vector<1x8x128xf32>,
    return
  }
  func.func @transform_0(%arg0: i32) -> (i32, i32) {
    %c0_i32 = arith.constant 0 : i32
    %c0_i32_0 = arith.constant 0 : i32
    return %arg0, %c0_i32 : i32, i32
  }
  func.func @transform_1(%arg0: i32) -> (i32, i32) {
    %c0_i32 = arith.constant 0 : i32
    %c0_i32_0 = arith.constant 0 : i32
    return %arg0, %c0_i32 : i32, i32
  }
  func.func @transform_2(%arg0: i32) -> (i32, i32) {
    %c0_i32 = arith.constant 0 : i32
    %c0_i32_0 = arith.constant 0 : i32
    return %arg0, %c0_i32 : i32, i32
  }
  func.func @transform_3(%arg0: i32) -> (i32, i32, i32) {
    %c0_i32 = arith.constant 0 : i32
    %c0_i32_0 = arith.constant 0 : i32
    %c0_i32_1 = arith.constant 0 : i32
    return %arg0, %c0_i32, %c0_i32_0 : i32, i32, i32
  }
}

</mosaic_0001>

<bundles_post_ra>
// kernel: tpu_custom_call.1
= control target key start
LH: loop header
LB: loop body
LE: loop exit
PB: predicated region body
PF: predicated region fallthrough
CT: control target
= control target key end

     0   :  { %8 = vsyncpa [#allocation3], 0  ;;  %s293_s0 = inlined_call_operand.hbm [shape: f32[8,32], index: 0, kind: input, shape index: {}]   ;;  %s294_s1 = inlined_call_operand.hbm [shape: f32[8,32], index: 1, kind: input, shape index: {}]   ;;  %s295_s2 = inlined_call_operand.hbm [shape: f32[8,32], index: 2, kind: input, shape index: {}]   ;;  %s296_s3 = inlined_call_operand.hbm [shape: f32[1,8,128], index: 3, kind: output, shape index: {}]  }
   0x1   :  { %9 = vsyncpa [#allocation6], 0 }
   0x2   :  { %10 = vsyncpa [#allocation4], 0  ;;  %s221_s12 = smov [#allocation5]   ;;  %s222_s14 = smov [#allocation2]  }
   0x3   :  { %s27_s13 = sshll.u32 %s221_s12, 4  ;;  %s17_s15 = sshll.u32 %s222_s14, 4  ;;  %s28_s13 = int_to_ptr.vmem [resolvable:$true] %s27_s13  ;;  %s18_s15 = int_to_ptr.vmem [resolvable:$true] %s17_s15 }
   0x4   :  { %s127_s18 = scalar_lea.hbm %s294_s1, 128 }
   0x5   :  { %p128_p0 = scmp.ne.s32.totalorder %s294_s1, %s127_s18  ;;  %p131_p1 = scmp.lt.u32.totalorder %s127_s18, %s294_s1 }
   0x7   :  { %p133_p2 = pnand %p131_p1, %p128_p0 }
   0x9   :  { %136 = shalt.err (!%p133_p2)
}
   0xa   :  { %s137_s23 = scalar_lea.vmem %s28_s13, 128  ;;  %p142_p4 = scmp.lt.s32.totalorder %s28_s13, %s28_s13 }
   0xb   :  { %p138_p3 = scmp.ne.s32.totalorder %s28_s13, %s137_s23  ;;  %p143_p5 = scmp.lt.s32.totalorder %s137_s23, %s137_s23 }
   0xd   :  { %p144_p6 = por %p143_p5, %p142_p4 }
   0xf   :  { %p145_p7 = pnand %p144_p6, %p138_p3 }
  0x11   :  { %148 = shalt.err (!%p145_p7)
}
  0x12   :  { %30 = dma.hbm_to_vmem [thread:$0]  %s294_s1, 128, %s28_s13, [#allocation6]  }
  0x13   :  { %s149_s28 = scalar_lea.hbm %s293_s0, 128 }
  0x14   :  { %p150_p8 = scmp.ne.s32.totalorder %s293_s0, %s149_s28  ;;  %p153_p9 = scmp.lt.u32.totalorder %s149_s28, %s293_s0 }
  0x16   :  { %p155_p10 = pnand %p153_p9, %p150_p8 }
  0x18   :  { %158 = shalt.err (!%p155_p10)
}
  0x19   :  { %s159_s6 = scalar_lea.vmem %s18_s15, 128  ;;  %p164_p12 = scmp.lt.s32.totalorder %s18_s15, %s18_s15 }
  0x1a   :  { %p160_p11 = scmp.ne.s32.totalorder %s18_s15, %s159_s6  ;;  %p165_p13 = scmp.lt.s32.totalorder %s159_s6, %s159_s6 }
  0x1c   :  { %p166_p0 = por %p165_p13, %p164_p12 }
  0x1e   :  { %p167_p1 = pnand %p166_p0, %p160_p11 }
  0x20   :  { %170 = shalt.err (!%p167_p1)
}
  0x21   :  { %20 = dma.hbm_to_vmem [thread:$0]  %s293_s0, 128, %s18_s15, [#allocation3]  }
  0x22   :  { %s223_s8 = smov [#allocation7]   ;;  %s171_s12 = scalar_lea.hbm %s295_s2, 128 }
  0x23   :  { %s37_s9 = sshll.u32 %s223_s8, 4  ;;  %p172_p2 = scmp.ne.s32.totalorder %s295_s2, %s171_s12  ;;  %s38_s9 = int_to_ptr.vmem [resolvable:$true] %s37_s9 }
  0x24   :  { %p175_p3 = scmp.lt.u32.totalorder %s171_s12, %s295_s2 }
  0x26   :  { %p177_p4 = pnand %p175_p3, %p172_p2 }
  0x28   :  { %180 = shalt.err (!%p177_p4)
}
  0x29   :  { %s181_s18 = scalar_lea.vmem %s38_s9, 128  ;;  %p186_p6 = scmp.lt.s32.totalorder %s38_s9, %s38_s9 }
  0x2a   :  { %p182_p5 = scmp.ne.s32.totalorder %s38_s9, %s181_s18  ;;  %p187_p7 = scmp.lt.s32.totalorder %s181_s18, %s181_s18 }
  0x2c   :  { %p188_p8 = por %p187_p7, %p186_p6 }
  0x2e   :  { %p189_p9 = pnand %p188_p8, %p182_p5 }
  0x30   :  { %192 = shalt.err (!%p189_p9)
}
  0x31   :  { %40 = dma.hbm_to_vmem [thread:$0]  %s295_s2, 128, %s38_s9, [#allocation6]  }
  0x32   :  { %215 = dma.done.wait [#allocation3], 128  }
  0x33   :  { %216 = vsyncadd [#allocation3], 4294967168 }
  0x34   :  { %217 = dma.done.wait [#allocation6], 256  }
  0x35   :  { %218 = vsyncadd [#allocation6], 4294967040  ;;  %v50_v0 = vld [vmem:[#allocation2] sm:$0xff]  ;;  %v51_v1 = vld [vmem:[#allocation5] sm:$0xff]  ;;  %vm54_vm0 = vcmask 261120   ;;  %vm88_vm5 = vcmask 7168  }
  0x36   :  { %v58_v2 = vld [vmem:[#allocation7] sm:$0xff]  ;;  %v52_v3 = vsub.f32 %v50_v0, %v51_v1  ;;  %s224_s2 = smov [#allocation8]  }
  0x37   :  { %v59_v4 = vsub.f32 %v50_v0, %v58_v2  ;;  %s107_s19 = sshll.u32 %s224_s2, 4  ;;  %s108_s19 = int_to_ptr.vmem [resolvable:$true] %s107_s19 }
  0x38   :  { %v53_v5 = vmul.f32 %v52_v3, %v52_v3  ;;  %s193_s21 = scalar_lea.vmem %s108_s19, 128  ;;  %p198_p11 = scmp.lt.s32.totalorder %s108_s19, %s108_s19 }
  0x39   :  { %v60_v6 = vmul.f32 %v59_v4, %v59_v4  ;;  %p194_p10 = scmp.ne.s32.totalorder %s108_s19, %s193_s21  ;;  %p199_p12 = scmp.lt.s32.totalorder %s193_s21, %s193_s21 }
  0x3a   :  { %v55_v7 = vsel %vm54_vm0, %v53_v5, 0.0 }
  0x3b   :  { %56 = vadd.xlane.f32.xlu0 %v55_v7  ;;  %v61_v8 = vsel %vm54_vm0, %v60_v6, 0.0  ;;  %p200_p13 = por %p199_p12, %p198_p11 }
  0x3d   :  { %p201_p0 = pnand %p200_p13, %p194_p10 }
  0x3f   :  { %62 = vadd.xlane.f32.xlu0 %v61_v8 }
  0xc8   :  { %v57_v9 = vpop.xlane.xlu0 %56 }
  0xc9   :  { %123 = vrsqrt.f32 %v57_v9  ;;  %vm66_vm1 = vcmp.eq.f32.partialorder %v57_v9, inf  ;;  %v69_v16 = vand.u32 2147483648, %v57_v9  ;;  %vm68_vm3 = vcmp.eq.f32.partialorder %v57_v9, 0.0 }
  0xcc   :  { %v63_v10 = vpop.xlane.xlu0 %62 }
  0xcd   :  { %125 = vrsqrt.f32 %v63_v10  ;;  %vm73_vm2 = vcmp.eq.f32.partialorder %v63_v10, inf  ;;  %v76_v17 = vand.u32 2147483648, %v63_v10  ;;  %vm75_vm4 = vcmp.eq.f32.partialorder %v63_v10, 0.0 }
  0xd3   :  { %v124_v11 = vpop.eup %123 }
  0xd4   :  { %v65_v12 = vmul.f32 %v124_v11, %v57_v9 }
  0xd6   :  { %v67_v15 = vsel %vm66_vm1, %v57_v9, %v65_v12 }
  0xd7   :  { %v126_v13 = vpop.eup %125  ;;  %v70_v19 = vsel %vm68_vm3, %v69_v16, %v67_v15 }
  0xd8   :  { %v72_v14 = vmul.f32 %v126_v13, %v63_v10 }
  0xda   :  { %v74_v18 = vsel %vm73_vm2, %v63_v10, %v72_v14 }
  0xdb   :  { %v77_v20 = vsel %vm75_vm4, %v76_v17, %v74_v18 }
  0xdc   :  { %v78_v21 = vsub.f32 %v70_v19, %v77_v20 }
  0xde   :  { %v79_v22 = vadd.f32 0.2, %v78_v21 }
  0xe0   :  { %v80_v23 = vmax.f32 %v79_v22, 0.0 }
  0xe2   :  { %v89_v24 = vsel %vm88_vm5, %v80_v23, 0.0 }
  0xe3   :  { %90 = vadd.xlane.f32.xlu1 %v89_v24 }
 0x170   :  { %v91_v25 = vpop.xlane.xlu1 %90 }
 0x171   :  { %v92_v26 = vrot.slane %v91_v25, 4 }
 0x173   :  { %v93_v27 = vadd.f32 %v92_v26, %v91_v25 }
 0x175   :  { %v94_v28 = vrot.slane %v93_v27, 2 }
 0x177   :  { %v95_v29 = vadd.f32 %v94_v28, %v93_v27 }
 0x179   :  { %v96_v30 = vrot.slane %v95_v29, 1 }
 0x17b   :  { %v97_v31 = vadd.f32 %v96_v30, %v95_v29 }
 0x17d   :  { %117 = vpush %v97_v31 }
 0x1ae   :  { %s118_s20 = spop %117 }
 0x1af   :  { %v99_v32 = vstv %s118_s20 }
 0x1b0   :  { %100 = vst [vmem:[#allocation8] sm:$0xff] %v99_v32 }
 0x1b1   :  { %204 = shalt.err (!%p201_p0)
}
 0x1b2   :  { %s205_s24 = scalar_lea.hbm %s296_s3, 128 }
 0x1b3   :  { %p206_p1 = scmp.ne.s32.totalorder %s296_s3, %s205_s24  ;;  %p209_p2 = scmp.lt.u32.totalorder %s205_s24, %s296_s3 }
 0x1b5   :  { %p211_p3 = pnand %p209_p2, %p206_p1 }
 0x1b7   :  { %214 = shalt.err (!%p211_p3)
}
 0x1b8   :  { %110 = dma.vmem_to_hbm [thread:$0]  %s108_s19, 128, %s296_s3, [#allocation4]  }
 0x1b9   :  { %219 = dma.done.wait [#allocation4], 128  }
 0x1ba   :  { %220 = vsyncadd [#allocation4], 4294967168 }
 0x1bb   :  { %114 = vsyncpa [#allocation3], 1 }
 0x1bc   :  { %115 = vsyncpa [#allocation6], 1 }
 0x1bd   :  { %116 = vsyncpa [#allocation4], 1 }

</bundles_post_ra>
